<compile_context>
chip_gen: v7x
topology: tpu7x:2x2x1
jax: 0.10.0
libtpu: 0.0.40
codegen_flags: <defaults>
</compile_context>

<pallas_src>
import functools

import jax
import jax.numpy as jnp
from jax.experimental import pallas as pl
from jax.experimental.pallas import tpu as pltpu


# ----------------------------------------------------------------------------
# Pallas kernel: one full HEATConv layer (+ final ReLU) over the whole graph.
# ----------------------------------------------------------------------------
def _heat_conv_kernel(
    x_ref,          # (N, C_in)    node features            (mm_dtype)
    ntype_ref,      # (N, 1)       node-type indices        (int32)
    etype_ref,      # (E, 1)       edge-type indices        (int32)
    eattr_ref,      # (E, D_e)     raw edge attributes      (mm_dtype)
    src_ref,        # (E, 1)       edge source indices      (int32)
    dst_ref,        # (E, 1)       edge destination indices (int32)
    hw_ref,         # (T_n*C_in, C_out)  HeteroLinear weights, type-major (mm_dtype)
    hb_ref,         # (T_n, C_out)       HeteroLinear biases (f32)
    ete_ref,        # (T_e, De_t)        edge-type embedding table (mm_dtype)
    wea_ref,        # (D_e, De_a)        edge-attr embedding weight (mm_dtype)
    watt_xi_ref,    # (C_out, H)         attention weight, x_i slice (mm_dtype)
    watt_xj_ref,    # (C_out, H)         attention weight, x_j slice (mm_dtype)
    watt_et_ref,    # (De_t, H)          attention weight, edge-type slice (mm_dtype)
    watt_ea_ref,    # (De_a, H)          attention weight, edge-attr slice (mm_dtype)
    wlin_xj_ref,    # (C_out, C_out)     message lin weight, x_j slice (mm_dtype)
    wlin_ea_ref,    # (De_a, C_out)      message lin weight, edge-attr slice (mm_dtype)
    out_ref,        # (N, out_pad)  lane-dense padded output (f32)
    *, num_ntypes, num_etypes, heads, neg_slope, concat, apply_relu, out_dim,
):
    f32 = jnp.float32
    mm = x_ref.dtype                      # matmul operand dtype (bf16 by default)

    def lrelu(v):
        return jnp.where(v > 0, v, neg_slope * v)

    n = x_ref.shape[0]
    e = src_ref.shape[0]
    c_in = x_ref.shape[1]
    c_out = hw_ref.shape[1]

    # --- type one-hots & incidence masks built in-kernel from index vectors ---
    nt_oh = (jax.lax.broadcasted_iota(jnp.int32, (n, num_ntypes), 1)
             == ntype_ref[...]).astype(f32)                          # (N, T_n)
    et_oh = (jax.lax.broadcasted_iota(jnp.int32, (e, num_etypes), 1)
             == etype_ref[...]).astype(mm)                           # (E, T_e)

    col = jax.lax.broadcasted_iota(jnp.int32, (e, n), 1)             # (E, N)
    src_eq = col == src_ref[...]                                     # (E, N) bool
    dst_eq = col == dst_ref[...]                                     # (E, N) bool
    S_mm = src_eq.astype(mm)                                         # gather x_j
    D_mm = dst_eq.astype(mm)                                         # gather x_i / scatter
    D_f32 = dst_eq.astype(f32)                                       # exact softmax plumbing
    # additive softmax mask computed ONCE (0 where incident, -1e30 elsewhere)
    mask_add = jnp.where(dst_eq, 0.0, -1e30).astype(f32)             # (E, N)

    # --- HeteroLinear fused into a single K = T_n*C_in matmul -----------------
    # x_blk[:, t*C_in + c] = nt_oh[:, t] * x[:, c]   (exact 0/1 selection)
    x_f32 = x_ref[...].astype(f32)
    x_blk = jnp.concatenate(
        [nt_oh[:, t:t + 1] * x_f32 for t in range(num_ntypes)], axis=-1)
    xt = (jnp.dot(x_blk.astype(mm), hw_ref[...], preferred_element_type=f32)
          + jnp.dot(nt_oh, hb_ref[...], preferred_element_type=f32))  # (N, C_out)

    # --- edge-level embeddings -------------------------------------------------
    ea_emb = lrelu(jnp.dot(eattr_ref[...], wea_ref[...],
                           preferred_element_type=f32))              # (E, De_a)
    et_emb = lrelu(jnp.dot(et_oh, ete_ref[...],
                           preferred_element_type=f32))              # (E, De_t)
    ea_mm = ea_emb.astype(mm)
    et_mm = et_emb.astype(mm)

    # --- gather endpoint features with MXU (exact 0/1 incidence weights) -------
    xt_mm = xt.astype(mm)
    x_j = jnp.dot(S_mm, xt_mm, preferred_element_type=f32)           # (E, C_out)
    x_i = jnp.dot(D_mm, xt_mm, preferred_element_type=f32)           # (E, C_out)
    x_j_mm = x_j.astype(mm)
    x_i_mm = x_i.astype(mm)

    # attention logits for ALL heads at once: att(cat([x_i, x_j, et, ea]))
    alpha = lrelu(
        jnp.dot(x_i_mm, watt_xi_ref[...], preferred_element_type=f32)
        + jnp.dot(x_j_mm, watt_xj_ref[...], preferred_element_type=f32)
        + jnp.dot(et_mm, watt_et_ref[...], preferred_element_type=f32)
        + jnp.dot(ea_mm, watt_ea_ref[...], preferred_element_type=f32))  # (E, H)

    # message content: lin(cat([x_j, ea_emb]))  (shared across heads)
    lin_out = (jnp.dot(x_j_mm, wlin_xj_ref[...], preferred_element_type=f32)
               + jnp.dot(ea_mm, wlin_ea_ref[...], preferred_element_type=f32))  # (E, C_out)

    # --- per-destination segment softmax, head-vectorized ----------------------
    # Only the segment-max is per-head (max has no matmul form); everything else
    # (gathers, sums, normalization, weighting, aggregation) handles all heads.
    seg_max_rows = []
    for h in range(heads):                                           # static, tiny
        seg_max_rows.append(
            jnp.max(alpha[:, h:h + 1] + mask_add, axis=0, keepdims=True))  # (1, N)
    seg_max_hn = jnp.concatenate(seg_max_rows, axis=0)               # (H, N)

    # gather per-dst max back to edges: contract the N dims on the MXU -> (E, H)
    max_e = jax.lax.dot_general(D_f32, seg_max_hn, (((1,), (1,)), ((), ())),
                                preferred_element_type=f32)
    ex = jnp.exp(alpha - max_e)                                      # (E, H) f32
    # per-dst sum of exp for all heads: contract the E dims (transposed Dm) -> (N, H)
    seg_sum_nh = jax.lax.dot_general(D_f32, ex, (((0,), (0,)), ((), ())),
                                     preferred_element_type=f32)
    # gather the sums back to edges, PyG adds 1e-16 to the denominator
    sum_e = jnp.dot(D_f32, seg_sum_nh, preferred_element_type=f32) + 1e-16
    a_sm = ex / sum_e                                                # (E, H)

    if concat:
        # weighted[:, h*C_out + c] = a_sm[:, h] * lin_out[:, c]  (head-major == torch .view)
        weighted = jnp.concatenate(
            [a_sm[:, h:h + 1] * lin_out for h in range(heads)], axis=-1)  # (E, H*C_out)
        # aggr='sum' back to destination nodes: contract E dims on the MXU
        out = jax.lax.dot_general(D_mm, weighted.astype(mm),
                                  (((0,), (0,)), ((), ())),
                                  preferred_element_type=f32)        # (N, H*C_out)
    else:
        # mean over heads commutes with the (head-independent) message content
        w_mean = jnp.mean(a_sm, axis=1, keepdims=True) * lin_out     # (E, C_out)
        out = jax.lax.dot_general(D_mm, w_mean.astype(mm),
                                  (((0,), (0,)), ((), ())),
                                  preferred_element_type=f32)        # (N, C_out)

    if apply_relu:
        out = jnp.maximum(out, 0.0)

    # lane-dense store: pad the last dim to the (multiple-of-128) output width
    pad = out_ref.shape[1] - out_dim
    if pad:
        out = jnp.concatenate([out, jnp.zeros((n, pad), f32)], axis=-1)
    out_ref[...] = out


# ----------------------------------------------------------------------------
# Parameter init (deterministic, torch-equivalent shapes, pre-transposed).
# ----------------------------------------------------------------------------
def init_heat_conv_params(key, *, in_channels, out_channels, num_ntypes,
                          num_etypes, etype_emb_dim, edge_dim, eattr_emb_dim,
                          heads):
    ks = jax.random.split(key, 6)
    s = 0.1
    # HeteroLinear: weight (T_n, C_in, C_out), bias (T_n, C_out)
    hw = jax.random.normal(ks[0], (num_ntypes, in_channels, out_channels), jnp.float32) * s
    hb = jax.random.normal(ks[1], (num_ntypes, out_channels), jnp.float32) * s
    # Embedding(num_edge_types, edge_type_emb_dim)
    ete = jax.random.normal(ks[2], (num_etypes, etype_emb_dim), jnp.float32) * s
    # Linear(edge_dim, eattr_emb_dim, bias=False) -> pre-transposed (D_e, De_a)
    wea = jax.random.normal(ks[3], (edge_dim, eattr_emb_dim), jnp.float32) * s
    # att: Linear(2*C_out + De_t + De_a, heads, bias=False) -> pre-transposed
    watt = jax.random.normal(
        ks[4], (2 * out_channels + etype_emb_dim + eattr_emb_dim, heads), jnp.float32) * s
    # lin: Linear(C_out + De_a, C_out, bias=False) -> pre-transposed
    wlin = jax.random.normal(
        ks[5], (out_channels + eattr_emb_dim, out_channels), jnp.float32) * s
    return dict(hw=hw, hb=hb, ete=ete, wea=wea, watt=watt, wlin=wlin)


# ----------------------------------------------------------------------------
# Wrapper: one HEATConv layer via pallas_call (only index vectors + features
# are DMA'd; all incidence/one-hot structure is rebuilt in-kernel).
# ----------------------------------------------------------------------------
def heat_conv_pallas(params, x, edge_index, ntypes, etypes, eattr, *,
                     num_ntypes, num_etypes, heads, neg_slope=0.2,
                     concat=True, apply_relu=True, mm_dtype=jnp.bfloat16,
                     lane_pad=128):
    n, c_in = x.shape
    e = edge_index.shape[1]
    c_out = params["hw"].shape[2]
    de_t = params["ete"].shape[1]
    de_a = params["wea"].shape[1]

    out_dim = heads * c_out if concat else c_out
    out_pad = ((out_dim + lane_pad - 1) // lane_pad) * lane_pad      # lane-dense output

    # weights: flatten / split / pre-cast once on the host side
    hw_flat = params["hw"].reshape(num_ntypes * c_in, c_out).astype(mm_dtype)
    hb = params["hb"].astype(jnp.float32)
    ete = params["ete"].astype(mm_dtype)
    wea = params["wea"].astype(mm_dtype)
    watt = params["watt"]
    watt_xi = watt[:c_out].astype(mm_dtype)
    watt_xj = watt[c_out:2 * c_out].astype(mm_dtype)
    watt_et = watt[2 * c_out:2 * c_out + de_t].astype(mm_dtype)
    watt_ea = watt[2 * c_out + de_t:].astype(mm_dtype)
    wlin = params["wlin"]
    wlin_xj = wlin[:c_out].astype(mm_dtype)
    wlin_ea = wlin[c_out:].astype(mm_dtype)

    # graph structure as tiny int32 index vectors (no E x N one-hots in HBM)
    src = edge_index[0].reshape(e, 1).astype(jnp.int32)
    dst = edge_index[1].reshape(e, 1).astype(jnp.int32)
    nt = ntypes.reshape(n, 1).astype(jnp.int32)
    et = etypes.reshape(e, 1).astype(jnp.int32)

    kernel = functools.partial(
        _heat_conv_kernel, num_ntypes=num_ntypes, num_etypes=num_etypes,
        heads=heads, neg_slope=neg_slope, concat=concat,
        apply_relu=apply_relu, out_dim=out_dim)

    # Explicit VMEM budget (v7x has 64 MiB physical / 32 MiB default scoped):
    # in-kernel (E, N) masks (bool + bf16 + f32 + mask_add) + operands + output,
    # with 4x headroom for temporaries, capped to be v7x-safe.
    mask_bytes = e * n * (1 + 2 + 4 + 4)
    io_bytes = (n * c_in + e * eattr.shape[1]) * 2 + n * out_pad * 4 + 4 * (n + 3 * e)
    vmem_budget = int(min(64 * 1024 * 1024,
                          max(4 * 1024 * 1024, 4 * (mask_bytes + io_bytes))))

    vmem = pl.BlockSpec(memory_space=pltpu.MemorySpace.VMEM)
    out_padded = pl.pallas_call(
        kernel,
        out_shape=jax.ShapeDtypeStruct((n, out_pad), jnp.float32),
        in_specs=[vmem] * 16,
        out_specs=vmem,
        compiler_params=pltpu.CompilerParams(vmem_limit_bytes=vmem_budget),
    )(
        x.astype(mm_dtype), nt, et, eattr.astype(mm_dtype), src, dst,
        hw_flat, hb, ete, wea, watt_xi, watt_xj, watt_et, watt_ea,
        wlin_xj, wlin_ea,
    )
    return out_padded[:, :out_dim]


def hetero_molecule_gnn_heat_forward(conv_params_list, x, edge_index, ntypes,
                                     etypes, eattr, *, num_ntypes, num_etypes,
                                     heads, neg_slope=0.2, concat=True):
    """Mirrors HeteroMoleculeGNN_HEAT.forward (eval mode)."""
    # TODO(synk): nn.Dropout between intermediate convs is identity in eval mode
    # (and never runs for num_convs=1); not implemented as a kernel op.
    for p in conv_params_list[:-1]:
        x = heat_conv_pallas(p, x, edge_index, ntypes, etypes, eattr,
                             num_ntypes=num_ntypes, num_etypes=num_etypes,
                             heads=heads, neg_slope=neg_slope, concat=concat,
                             apply_relu=True)
    x = heat_conv_pallas(conv_params_list[-1], x, edge_index, ntypes, etypes,
                         eattr, num_ntypes=num_ntypes, num_etypes=num_etypes,
                         heads=heads, neg_slope=neg_slope, concat=concat,
                         apply_relu=True)
    return x


if __name__ == "__main__":
    # Small synthetic molecule graph (single graph, homogeneous representation).
    N, E = 16, 32                 # nodes, directed edges
    in_channels = 8
    out_channels = 8              # per-head out channels
    edge_dim = 6
    num_ntypes, num_etypes = 4, 5
    etype_emb_dim = 4             # edge_type_emb_dim
    eattr_emb_dim = 4
    heads = 2
    num_convs = 1                 # default; concat=True output dim = heads*out_channels

    key = jax.random.PRNGKey(0)
    kx, ke, kn, kt, ka, kp = jax.random.split(key, 6)
    x = jax.random.normal(kx, (N, in_channels), dtype=jnp.float32)
    edge_index = jax.random.randint(ke, (2, E), 0, N, dtype=jnp.int32)
    ntypes = jax.random.randint(kn, (N,), 0, num_ntypes, dtype=jnp.int32)
    etypes = jax.random.randint(kt, (E,), 0, num_etypes, dtype=jnp.int32)
    eattr = jax.random.normal(ka, (E, edge_dim), dtype=jnp.float32)

    conv_params = [
        init_heat_conv_params(
            kp, in_channels=in_channels, out_channels=out_channels,
            num_ntypes=num_ntypes, num_etypes=num_etypes,
            etype_emb_dim=etype_emb_dim, edge_dim=edge_dim,
            eattr_emb_dim=eattr_emb_dim, heads=heads)
        for _ in range(num_convs)
    ]

    out = hetero_molecule_gnn_heat_forward(
        conv_params, x, edge_index, ntypes, etypes, eattr,
        num_ntypes=num_ntypes, num_etypes=num_etypes, heads=heads,
        neg_slope=0.2, concat=True)
    out = jax.block_until_ready(out)

    assert out.shape == (N, heads * out_channels), out.shape
    assert out.dtype == jnp.float32
    assert bool(jnp.all(jnp.isfinite(out)))
    print("KERNEL_OK")
</pallas_src>

<mosaic_0001>
module attributes {stable_mosaic.version = 11 : i64} {
  func.func @_heat_conv_kernel(%arg0: memref<16x8xbf16, #tpu.memory_space<vmem>>, %arg1: memref<16x1xi32, #tpu.memory_space<vmem>>, %arg2: memref<32x1xi32, #tpu.memory_space<vmem>>, %arg3: memref<32x6xbf16, #tpu.memory_space<vmem>>, %arg4: memref<32x1xi32, #tpu.memory_space<vmem>>, %arg5: memref<32x1xi32, #tpu.memory_space<vmem>>, %arg6: memref<32x8xbf16, #tpu.memory_space<vmem>>, %arg7: memref<4x8xf32, #tpu.memory_space<vmem>>, %arg8: memref<5x4xbf16, #tpu.memory_space<vmem>>, %arg9: memref<6x4xbf16, #tpu.memory_space<vmem>>, %arg10: memref<8x2xbf16, #tpu.memory_space<vmem>>, %arg11: memref<8x2xbf16, #tpu.memory_space<vmem>>, %arg12: memref<4x2xbf16, #tpu.memory_space<vmem>>, %arg13: memref<4x2xbf16, #tpu.memory_space<vmem>>, %arg14: memref<8x8xbf16, #tpu.memory_space<vmem>>, %arg15: memref<4x8xbf16, #tpu.memory_space<vmem>>, %arg16: memref<16x128xf32, #tpu.memory_space<vmem>>) attributes {dimension_semantics = [], scalar_prefetch = 0 : i64, scratch_operands = 0 : i64, tpu.core_type = #tpu.core_type<tc>} {
    %0 = tpu.iota {dimensions = array<i32: 1>} : vector<16x4xi32>
    %c0 = arith.constant 0 : index
    %c0_0 = arith.constant 0 : index
    %1 = vector.load %arg1[%c0, %c0_0] : memref<16x1xi32, #tpu.memory_space<vmem>>, vector<16x1xi32>
    %2 = vector.broadcast %1 : vector<16x1xi32> to vector<16x4xi32>
    %3 = arith.cmpi eq, %0, %2 : vector<16x4xi32>
    %4 = arith.extui %3 : vector<16x4xi1> to vector<16x4xi32>
    %5 = arith.sitofp %4 : vector<16x4xi32> to vector<16x4xf32>
    %6 = tpu.iota {dimensions = array<i32: 1>} : vector<32x5xi32>
    %c0_1 = arith.constant 0 : index
    %c0_2 = arith.constant 0 : index
    %7 = vector.load %arg2[%c0_1, %c0_2] : memref<32x1xi32, #tpu.memory_space<vmem>>, vector<32x1xi32>
    %8 = vector.broadcast %7 : vector<32x1xi32> to vector<32x5xi32>
    %9 = arith.cmpi eq, %6, %8 : vector<32x5xi32>
    %10 = arith.extui %9 : vector<32x5xi1> to vector<32x5xi32>
    %11 = arith.sitofp %10 : vector<32x5xi32> to vector<32x5xf32>
    %12 = arith.truncf %11 : vector<32x5xf32> to vector<32x5xbf16>
    %13 = tpu.iota {dimensions = array<i32: 1>} : vector<32x16xi32>
    %c0_3 = arith.constant 0 : index
    %c0_4 = arith.constant 0 : index
    %14 = vector.load %arg4[%c0_3, %c0_4] : memref<32x1xi32, #tpu.memory_space<vmem>>, vector<32x1xi32>
    %15 = vector.broadcast %14 : vector<32x1xi32> to vector<32x16xi32>
    %16 = arith.cmpi eq, %13, %15 : vector<32x16xi32>
    %c0_5 = arith.constant 0 : index
    %c0_6 = arith.constant 0 : index
    %17 = vector.load %arg5[%c0_5, %c0_6] : memref<32x1xi32, #tpu.memory_space<vmem>>, vector<32x1xi32>
    %18 = vector.broadcast %17 : vector<32x1xi32> to vector<32x16xi32>
    %19 = arith.cmpi eq, %13, %18 : vector<32x16xi32>
    %20 = arith.extui %16 : vector<32x16xi1> to vector<32x16xi32>
    %21 = arith.sitofp %20 : vector<32x16xi32> to vector<32x16xf32>
    %22 = arith.truncf %21 : vector<32x16xf32> to vector<32x16xbf16>
    %23 = arith.extui %19 : vector<32x16xi1> to vector<32x16xi32>
    %24 = arith.sitofp %23 : vector<32x16xi32> to vector<32x16xf32>
    %25 = arith.truncf %24 : vector<32x16xf32> to vector<32x16xbf16>
    %26 = arith.extui %19 : vector<32x16xi1> to vector<32x16xi32>
    %27 = arith.sitofp %26 : vector<32x16xi32> to vector<32x16xf32>
    %cst = arith.constant 0.000000e+00 : f32
    %cst_7 = arith.constant -1.000000e+30 : f32
    %28 = vector.broadcast %cst : f32 to vector<32x16xf32>
    %29 = vector.broadcast %cst_7 : f32 to vector<32x16xf32>
    %30 = arith.select %19, %28, %29 : vector<32x16xi1>, vector<32x16xf32>
    %c0_8 = arith.constant 0 : index
    %c0_9 = arith.constant 0 : index
    %31 = vector.load %arg0[%c0_8, %c0_9] : memref<16x8xbf16, #tpu.memory_space<vmem>>, vector<16x8xbf16>
    %32 = arith.extf %31 : vector<16x8xbf16> to vector<16x8xf32>
    %33 = vector.extract_strided_slice %5 {offsets = [0, 0], sizes = [16, 1], strides = [1, 1]} : vector<16x4xf32> to vector<16x1xf32>
    %34 = vector.broadcast %33 : vector<16x1xf32> to vector<16x8xf32>
    %35 = arith.mulf %34, %32 : vector<16x8xf32>
    %36 = vector.extract_strided_slice %5 {offsets = [0, 1], sizes = [16, 1], strides = [1, 1]} : vector<16x4xf32> to vector<16x1xf32>
    %37 = vector.broadcast %36 : vector<16x1xf32> to vector<16x8xf32>
    %38 = arith.mulf %37, %32 : vector<16x8xf32>
    %39 = vector.extract_strided_slice %5 {offsets = [0, 2], sizes = [16, 1], strides = [1, 1]} : vector<16x4xf32> to vector<16x1xf32>
    %40 = vector.broadcast %39 : vector<16x1xf32> to vector<16x8xf32>
    %41 = arith.mulf %40, %32 : vector<16x8xf32>
    %42 = vector.extract_strided_slice %5 {offsets = [0, 3], sizes = [16, 1], strides = [1, 1]} : vector<16x4xf32> to vector<16x1xf32>
    %43 = vector.broadcast %42 : vector<16x1xf32> to vector<16x8xf32>
    %44 = arith.mulf %43, %32 : vector<16x8xf32>
    %45 = tpu.concatenate %35, %38, %41, %44 in 1 : vector<16x8xf32>, vector<16x8xf32>, vector<16x8xf32>, vector<16x8xf32> -> vector<16x32xf32>
    %46 = arith.truncf %45 : vector<16x32xf32> to vector<16x32xbf16>
    %c0_10 = arith.constant 0 : index
    %c0_11 = arith.constant 0 : index
    %47 = vector.load %arg6[%c0_10, %c0_11] : memref<32x8xbf16, #tpu.memory_space<vmem>>, vector<32x8xbf16>
    %cst_12 = arith.constant dense<0.000000e+00> : vector<16x8xf32>
    %48 = tpu.matmul %46, %47, %cst_12 {dimension_numbers = #tpu.dot_dimension_numbers<[1], [0], [0], [1], [0, 0, 1, 1], [], []>} : vector<16x32xbf16>, vector<32x8xbf16>, vector<16x8xf32> -> vector<16x8xf32>
    %c0_13 = arith.constant 0 : index
    %c0_14 = arith.constant 0 : index
    %49 = vector.load %arg7[%c0_13, %c0_14] : memref<4x8xf32, #tpu.memory_space<vmem>>, vector<4x8xf32>
    %cst_15 = arith.constant dense<0.000000e+00> : vector<16x8xf32>
    %50 = tpu.matmul %5, %49, %cst_15 {dimension_numbers = #tpu.dot_dimension_numbers<[1], [0], [0], [1], [0, 0, 1, 1], [], []>} : vector<16x4xf32>, vector<4x8xf32>, vector<16x8xf32> -> vector<16x8xf32>
    %51 = arith.addf %48, %50 : vector<16x8xf32>
    %c0_16 = arith.constant 0 : index
    %c0_17 = arith.constant 0 : index
    %52 = vector.load %arg3[%c0_16, %c0_17] : memref<32x6xbf16, #tpu.memory_space<vmem>>, vector<32x6xbf16>
    %c0_18 = arith.constant 0 : index
    %c0_19 = arith.constant 0 : index
    %53 = vector.load %arg9[%c0_18, %c0_19] : memref<6x4xbf16, #tpu.memory_space<vmem>>, vector<6x4xbf16>
    %cst_20 = arith.constant dense<0.000000e+00> : vector<32x4xf32>
    %54 = tpu.matmul %52, %53, %cst_20 {dimension_numbers = #tpu.dot_dimension_numbers<[1], [0], [0], [1], [0, 0, 1, 1], [], []>} : vector<32x6xbf16>, vector<6x4xbf16>, vector<32x4xf32> -> vector<32x4xf32>
    %cst_21 = arith.constant 0.000000e+00 : f32
    %55 = vector.broadcast %cst_21 : f32 to vector<32x4xf32>
    %56 = arith.cmpf ogt, %54, %55 : vector<32x4xf32>
    %cst_22 = arith.constant 2.000000e-01 : f32
    %57 = vector.broadcast %cst_22 : f32 to vector<32x4xf32>
    %58 = arith.mulf %57, %54 : vector<32x4xf32>
    %59 = arith.select %56, %54, %58 : vector<32x4xi1>, vector<32x4xf32>
    %c0_23 = arith.constant 0 : index
    %c0_24 = arith.constant 0 : index
    %60 = vector.load %arg8[%c0_23, %c0_24] : memref<5x4xbf16, #tpu.memory_space<vmem>>, vector<5x4xbf16>
    %cst_25 = arith.constant dense<0.000000e+00> : vector<32x4xf32>
    %61 = tpu.matmul %12, %60, %cst_25 {dimension_numbers = #tpu.dot_dimension_numbers<[1], [0], [0], [1], [0, 0, 1, 1], [], []>} : vector<32x5xbf16>, vector<5x4xbf16>, vector<32x4xf32> -> vector<32x4xf32>
    %cst_26 = arith.constant 0.000000e+00 : f32
    %62 = vector.broadcast %cst_26 : f32 to vector<32x4xf32>
    %63 = arith.cmpf ogt, %61, %62 : vector<32x4xf32>
    %cst_27 = arith.constant 2.000000e-01 : f32
    %64 = vector.broadcast %cst_27 : f32 to vector<32x4xf32>
    %65 = arith.mulf %64, %61 : vector<32x4xf32>
    %66 = arith.select %63, %61, %65 : vector<32x4xi1>, vector<32x4xf32>
    %67 = arith.truncf %59 : vector<32x4xf32> to vector<32x4xbf16>
    %68 = arith.truncf %66 : vector<32x4xf32> to vector<32x4xbf16>
    %69 = arith.truncf %51 : vector<16x8xf32> to vector<16x8xbf16>
    %cst_28 = arith.constant dense<0.000000e+00> : vector<32x8xf32>
    %70 = tpu.matmul %22, %69, %cst_28 {dimension_numbers = #tpu.dot_dimension_numbers<[1], [0], [0], [1], [0, 0, 1, 1], [], []>} : vector<32x16xbf16>, vector<16x8xbf16>, vector<32x8xf32> -> vector<32x8xf32>
    %cst_29 = arith.constant dense<0.000000e+00> : vector<32x8xf32>
    %71 = tpu.matmul %25, %69, %cst_29 {dimension_numbers = #tpu.dot_dimension_numbers<[1], [0], [0], [1], [0, 0, 1, 1], [], []>} : vector<32x16xbf16>, vector<16x8xbf16>, vector<32x8xf32> -> vector<32x8xf32>
    %72 = arith.truncf %70 : vector<32x8xf32> to vector<32x8xbf16>
    %73 = arith.truncf %71 : vector<32x8xf32> to vector<32x8xbf16>
    %c0_30 = arith.constant 0 : index
    %c0_31 = arith.constant 0 : index
    %74 = vector.load %arg10[%c0_30, %c0_31] : memref<8x2xbf16, #tpu.memory_space<vmem>>, vector<8x2xbf16>
    %cst_32 = arith.constant dense<0.000000e+00> : vector<32x2xf32>
    %75 = tpu.matmul %73, %74, %cst_32 {dimension_numbers = #tpu.dot_dimension_numbers<[1], [0], [0], [1], [0, 0, 1, 1], [], []>} : vector<32x8xbf16>, vector<8x2xbf16>, vector<32x2xf32> -> vector<32x2xf32>
    %c0_33 = arith.constant 0 : index
    %c0_34 = arith.constant 0 : index
    %76 = vector.load %arg11[%c0_33, %c0_34] : memref<8x2xbf16, #tpu.memory_space<vmem>>, vector<8x2xbf16>
    %cst_35 = arith.constant dense<0.000000e+00> : vector<32x2xf32>
    %77 = tpu.matmul %72, %76, %cst_35 {dimension_numbers = #tpu.dot_dimension_numbers<[1], [0], [0], [1], [0, 0, 1, 1], [], []>} : vector<32x8xbf16>, vector<8x2xbf16>, vector<32x2xf32> -> vector<32x2xf32>
    %78 = arith.addf %75, %77 : vector<32x2xf32>
    %c0_36 = arith.constant 0 : index
    %c0_37 = arith.constant 0 : index
    %79 = vector.load %arg12[%c0_36, %c0_37] : memref<4x2xbf16, #tpu.memory_space<vmem>>, vector<4x2xbf16>
    %cst_38 = arith.constant dense<0.000000e+00> : vector<32x2xf32>
    %80 = tpu.matmul %68, %79, %cst_38 {dimension_numbers = #tpu.dot_dimension_numbers<[1], [0], [0], [1], [0, 0, 1, 1], [], []>} : vector<32x4xbf16>, vector<4x2xbf16>, vector<32x2xf32> -> vector<32x2xf32>
    %81 = arith.addf %78, %80 : vector<32x2xf32>
    %c0_39 = arith.constant 0 : index
    %c0_40 = arith.constant 0 : index
    %82 = vector.load %arg13[%c0_39, %c0_40] : memref<4x2xbf16, #tpu.memory_space<vmem>>, vector<4x2xbf16>
    %cst_41 = arith.constant dense<0.000000e+00> : vector<32x2xf32>
    %83 = tpu.matmul %67, %82, %cst_41 {dimension_numbers = #tpu.dot_dimension_numbers<[1], [0], [0], [1], [0, 0, 1, 1], [], []>} : vector<32x4xbf16>, vector<4x2xbf16>, vector<32x2xf32> -> vector<32x2xf32>
    %84 = arith.addf %81, %83 : vector<32x2xf32>
    %cst_42 = arith.constant 0.000000e+00 : f32
    %85 = vector.broadcast %cst_42 : f32 to vector<32x2xf32>
    %86 = arith.cmpf ogt, %84, %85 : vector<32x2xf32>
    %cst_43 = arith.constant 2.000000e-01 : f32
    %87 = vector.broadcast %cst_43 : f32 to vector<32x2xf32>
    %88 = arith.mulf %87, %84 : vector<32x2xf32>
    %89 = arith.select %86, %84, %88 : vector<32x2xi1>, vector<32x2xf32>
    %c0_44 = arith.constant 0 : index
    %c0_45 = arith.constant 0 : index
    %90 = vector.load %arg14[%c0_44, %c0_45] : memref<8x8xbf16, #tpu.memory_space<vmem>>, vector<8x8xbf16>
    %cst_46 = arith.constant dense<0.000000e+00> : vector<32x8xf32>
    %91 = tpu.matmul %72, %90, %cst_46 {dimension_numbers = #tpu.dot_dimension_numbers<[1], [0], [0], [1], [0, 0, 1, 1], [], []>} : vector<32x8xbf16>, vector<8x8xbf16>, vector<32x8xf32> -> vector<32x8xf32>
    %c0_47 = arith.constant 0 : index
    %c0_48 = arith.constant 0 : index
    %92 = vector.load %arg15[%c0_47, %c0_48] : memref<4x8xbf16, #tpu.memory_space<vmem>>, vector<4x8xbf16>
    %cst_49 = arith.constant dense<0.000000e+00> : vector<32x8xf32>
    %93 = tpu.matmul %67, %92, %cst_49 {dimension_numbers = #tpu.dot_dimension_numbers<[1], [0], [0], [1], [0, 0, 1, 1], [], []>} : vector<32x4xbf16>, vector<4x8xbf16>, vector<32x8xf32> -> vector<32x8xf32>
    %94 = arith.addf %91, %93 : vector<32x8xf32>
    %95 = vector.extract_strided_slice %89 {offsets = [0, 0], sizes = [32, 1], strides = [1, 1]} : vector<32x2xf32> to vector<32x1xf32>
    %96 = vector.broadcast %95 : vector<32x1xf32> to vector<32x16xf32>
    %97 = arith.addf %96, %30 : vector<32x16xf32>
    %cst_50 = arith.constant dense<0xFF800000> : vector<16xf32>
    %98 = vector.multi_reduction <maximumf>, %97, %cst_50 [0] : vector<32x16xf32> to vector<16xf32>
    %99 = vector.shape_cast %98 : vector<16xf32> to vector<1x16xf32>
    %100 = vector.extract_strided_slice %89 {offsets = [0, 1], sizes = [32, 1], strides = [1, 1]} : vector<32x2xf32> to vector<32x1xf32>
    %101 = vector.broadcast %100 : vector<32x1xf32> to vector<32x16xf32>
    %102 = arith.addf %101, %30 : vector<32x16xf32>
    %cst_51 = arith.constant dense<0xFF800000> : vector<16xf32>
    %103 = vector.multi_reduction <maximumf>, %102, %cst_51 [0] : vector<32x16xf32> to vector<16xf32>
    %104 = vector.shape_cast %103 : vector<16xf32> to vector<1x16xf32>
    %105 = tpu.concatenate %99, %104 in 0 : vector<1x16xf32>, vector<1x16xf32> -> vector<2x16xf32>
    %cst_52 = arith.constant dense<0.000000e+00> : vector<32x2xf32>
    %106 = tpu.matmul %27, %105, %cst_52 {dimension_numbers = #tpu.dot_dimension_numbers<[1], [1], [0], [0], [0, 0, 1, 0], [], []>} : vector<32x16xf32>, vector<2x16xf32>, vector<32x2xf32> -> vector<32x2xf32>
    %107 = arith.subf %89, %106 : vector<32x2xf32>
    %108 = math.exp %107 : vector<32x2xf32>
    %cst_53 = arith.constant dense<0.000000e+00> : vector<16x2xf32>
    %109 = tpu.matmul %27, %108, %cst_53 {dimension_numbers = #tpu.dot_dimension_numbers<[0], [0], [1], [1], [0, 1, 1, 1], [], []>} : vector<32x16xf32>, vector<32x2xf32>, vector<16x2xf32> -> vector<16x2xf32>
    %cst_54 = arith.constant dense<0.000000e+00> : vector<32x2xf32>
    %110 = tpu.matmul %27, %109, %cst_54 {dimension_numbers = #tpu.dot_dimension_numbers<[1], [0], [0], [1], [0, 0, 1, 1], [], []>} : vector<32x16xf32>, vector<16x2xf32>, vector<32x2xf32> -> vector<32x2xf32>
    %cst_55 = arith.constant 1.000000e-16 : f32
    %111 = vector.broadcast %cst_55 : f32 to vector<32x2xf32>
    %112 = arith.addf %110, %111 : vector<32x2xf32>
    %113 = arith.divf %108, %112 : vector<32x2xf32>
    %114 = vector.extract_strided_slice %113 {offsets = [0, 0], sizes = [32, 1], strides = [1, 1]} : vector<32x2xf32> to vector<32x1xf32>
    %115 = vector.broadcast %114 : vector<32x1xf32> to vector<32x8xf32>
    %116 = arith.mulf %115, %94 : vector<32x8xf32>
    %117 = vector.extract_strided_slice %113 {offsets = [0, 1], sizes = [32, 1], strides = [1, 1]} : vector<32x2xf32> to vector<32x1xf32>
    %118 = vector.broadcast %117 : vector<32x1xf32> to vector<32x8xf32>
    %119 = arith.mulf %118, %94 : vector<32x8xf32>
    %120 = tpu.concatenate %116, %119 in 1 : vector<32x8xf32>, vector<32x8xf32> -> vector<32x16xf32>
    %121 = arith.truncf %120 : vector<32x16xf32> to vector<32x16xbf16>
    %cst_56 = arith.constant dense<0.000000e+00> : vector<16x16xf32>
    %122 = tpu.matmul %25, %121, %cst_56 {dimension_numbers = #tpu.dot_dimension_numbers<[0], [0], [1], [1], [0, 1, 1, 1], [], []>} : vector<32x16xbf16>, vector<32x16xbf16>, vector<16x16xf32> -> vector<16x16xf32>
    %cst_57 = arith.constant 0.000000e+00 : f32
    %123 = vector.broadcast %cst_57 : f32 to vector<16x16xf32>
    %124 = arith.maximumf %122, %123 : vector<16x16xf32>
    %cst_58 = arith.constant 0.000000e+00 : f32
    %125 = vector.broadcast %cst_58 : f32 to vector<16x112xf32>
    %126 = tpu.concatenate %124, %125 in 1 : vector<16x16xf32>, vector<16x112xf32> -> vector<16x128xf32>
    %c0_59 = arith.constant 0 : index
    %c0_60 = arith.constant 0 : index
    %127 = vector.load %arg16[%c0_59, %c0_60] : memref<16x128xf32, #tpu.memory_space<vmem>>, vector<16x128xf32>
    tpu.vector_store %arg16[%c0_59, %c0_60], %126 {strides = array<i32>} : memref<16x128xf32, #tpu.memory_space<vmem>>, vector<16x128xf32>,
    return
  }
}

</mosaic_0001>

<bundles_post_ra>
// kernel: tpu_custom_call.1
= control target key start
LH: loop header
LB: loop body
LE: loop exit
PB: predicated region body
PF: predicated region fallthrough
CT: control target
= control target key end

     0   :  { %s2392_s0 = inlined_call_operand.vmem [shape: bf16[16,8], index: 0, kind: input, shape index: {}]   ;;  %s2393_s1 = inlined_call_operand.vmem [shape: s32[16,1], index: 1, kind: input, shape index: {}]   ;;  %s2394_s2 = inlined_call_operand.vmem [shape: s32[32,1], index: 2, kind: input, shape index: {}]   ;;  %s2395_s3 = inlined_call_operand.vmem [shape: bf16[32,6], index: 3, kind: input, shape index: {}]   ;;  %s2396_s4 = inlined_call_operand.vmem [shape: s32[32,1], index: 4, kind: input, shape index: {}]   ;;  %s2397_s5 = inlined_call_operand.vmem [shape: s32[32,1], index: 5, kind: input, shape index: {}]   ;;  %s2398_s6 = inlined_call_operand.vmem [shape: bf16[32,8], index: 6, kind: input, shape index: {}]   ;;  %s2399_s7 = inlined_call_operand.vmem [shape: f32[4,8], index: 7, kind: input, shape index: {}]   ;;  %s2400_s8 = inlined_call_operand.vmem [shape: bf16[5,4], index: 8, kind: input, shape index: {}]   ;;  %s2401_s9 = inlined_call_operand.vmem [shape: bf16[6,4], index: 9, kind: input, shape index: {}]   ;;  %s2402_s10 = inlined_call_operand.vmem [shape: bf16[8,2], index: 10, kind: input, shape index: {}]   ;;  %s2403_s11 = inlined_call_operand.vmem [shape: bf16[8,2], index: 11, kind: input, shape index: {}]   ;;  %s2404_s12 = inlined_call_operand.vmem [shape: bf16[4,2], index: 12, kind: input, shape index: {}]   ;;  %s2405_s13 = inlined_call_operand.vmem [shape: bf16[4,2], index: 13, kind: input, shape index: {}]   ;;  %s2406_s14 = inlined_call_operand.vmem [shape: bf16[8,8], index: 14, kind: input, shape index: {}]   ;;  %s2407_s15 = inlined_call_operand.vmem [shape: bf16[4,8], index: 15, kind: input, shape index: {}]   ;;  %s2408_s16 = inlined_call_operand.hbm [shape: f32[16,128], index: 16, kind: output, shape index: {}]  }
   0x1   :  { %2409 = sst [smem:[#allocation5_spill]] %s2392_s0 }
   0x2   :  { %v57_v0 = vld [vmem:[%s2393_s1] sm:$0xff]  ;;  %v1942_v1 = vmov 0   ;;  %v58_v2 = vld [vmem:[%s2393_s1 + $0x8] sm:$0xff] }
   0x3   :  { %1844 = vset.pattern.permute.xlu0 %v1942_v1 }
   0x4   :  { %60 = vperm.xlu0 %1844, %v57_v0  }
   0x5   :  { %21 = vsyncpa [#allocation3], 0  ;;  %v249_v3 = vld [vmem:[%s2399_s7] sm:$0xf]  ;;  %vm255_vm0 = vcmask 1043456   ;;  %v1943_v4 = vmov 0.0   ;;  %v55_v7 = vlaneseq }
   0x6   :  { %1686 = vmatprep.subr.msk.mxu1 %vm255_vm0, %v249_v3  ;;  %v1944_v5 = vmov 1   ;;  %v1945_v6 = vmov 3   ;;  %vm250_vm1 = vcmask 31744   ;;  %v1946_v14 = vmov 2   ;;  %s2410_s27 = sld [smem:[#allocation5_spill]]  ;;  %v1898_v16 = vld [vmem:[%s2398_s6] sm:$0xff]  }
   0x7   :  { %1687 = vmatpush3.msk.msra.mxu1 %vm255_vm0, %v249_v3  ;;  %1845 = vset.pattern.permute.xlu1 %v1944_v5  ;;  %v2054_v8 = vand.u32 127, %v55_v7  ;;  %v1899_v21 = vld [vmem:[%s2398_s6 + $0x8] sm:$0xff]   ;;  %vm1947_vm4 = vmmov 0   ;;  %s1948_s6 = smov 8   ;;  %s1949_s17 = smov 24   ;;  %v101_v39 = vld [vmem:[%s2396_s4] sm:$0xff] }
   0x8   :  { %63 = vperm.xlu0 %1844, %v58_v2   ;;  %1691 = vmatprep.subr.bf16.mxu1 %v1943_v4  ;;  %s1950_s18 = smov 16   ;;  %v102_v38 = vld [vmem:[%s2396_s4 + $0x8] sm:$0xff]  ;;  %v103_v40 = vld [vmem:[%s2396_s4 + $0x10] sm:$0xff]  ;;  %v104_v41 = vld [vmem:[%s2396_s4 + $0x18] sm:$0xff]  ;;  %vm413_vm5 = vcmask 1042432   ;;  %vm486_vm6 = vcmask 1041408  }
   0x9   :  { %v395_v42 = vld [vmem:[%s2401_s9] sm:$0x7]  ;;  %v72_v45 = vld [vmem:[%s2394_s2 + $0x8] sm:$0xff]  ;;  %vm406_vm7 = vcmask 48128   ;;  %v1951_v48 = vmov 65535   ;;  %v73_v50 = vld [vmem:[%s2394_s2 + $0x10] sm:$0xff] }
   0xa   :  { %v71_v43 = vld [vmem:[%s2394_s2] sm:$0xff]  ;;  %1824 = vmatprep.subr.msk.bf16.mxu0 %vm413_vm5, %v395_v42  ;;  %v415_v44 = vsel %vm413_vm5, %v395_v42, 0  ;;  %v1901_v47 = vld [vmem:[%s2395_s3 + $0x8] sm:$0xff]   ;;  %v487_v49 = vsel %vm486_vm6, 4294967295, %v1951_v48  ;;  %v74_v52 = vld [vmem:[%s2394_s2 + $0x18] sm:$0xff]  ;;  %vm235_vm8 = vcmask 64512  }
   0xb   :  { %1700 = vmatpush3.bf16.msra.mxu0 %v415_v44  ;;  %v1900_v46 = vld [vmem:[%s2395_s3] sm:$0xff]   ;;  %v488_v51 = vsel %vm413_vm5, %v487_v49, 0  ;;  %v122_v56 = vld [vmem:[%s2397_s5 + $0x8] sm:$0xff]  ;;  %v123_v57 = vld [vmem:[%s2397_s5 + $0x10] sm:$0xff]  ;;  %vm238_vm9 = vcmask 130048   ;;  %vm241_vm10 = vcmask 195584  }
   0xc   :  { %1857 = vset.pattern.permute.xlu0 %v1945_v6  ;;  %v1627_v15 = vld [vmem:[%s2410_s27] sm:$0xff]   ;;  %1701 = vmatprep.mubr.msk.bf16.mxu0 %vm406_vm7, %v1900_v46  ;;  %v124_v58 = vld [vmem:[%s2397_s5 + $0x18] sm:$0xff]  ;;  %vm346_vm11 = vcmask 261120   ;;  %vm479_vm5 = vcmask 39936  }
   0xd   :  { %v2070_v17 = vunpack.c.l.bf16 %v1627_v15  ;;  %v2072_v18 = vunpack.c.h.bf16 %v1627_v15  ;;  %v478_v53 = vld [vmem:[%s2400_s8] sm:$0x7] }
   0xe   :  { %1702 = vmatmul.mubr.msk.bf16.vlgmr.msra.gmra.mrb[0].mxu0 %vm406_vm7, %v1901_v47  ;;  %v490_v54 = vand.u32 %v488_v51, %v478_v53  ;;  %v121_v55 = vld [vmem:[%s2397_s5] sm:$0xff] }
  0x10   :  { %1705 = vmatprep.subr.bf16.mxu0 %v490_v54 }
  0x11   :  { %1706 = vmatpush3.bf16.msra.mxu0 %v490_v54 }
  0x83   :  { %v61_v9 = vpop.permute.xlu0 %60 }
  0x84   :  { %vm65_vm2 = vcmp.eq.s32.totalorder %v2054_v8, %v61_v9 }
  0x85   :  { %v1572_v10 = vsel %vm65_vm2, 1.0, %v1943_v4 }
  0x86   :  { %1688 = vmatprep.mubr.msk.f32.mxu1 %vm250_vm1, %v1572_v10 }
  0x87   :  { %v64_v11 = vpop.permute.xlu0 %63 }
  0x88   :  { %vm66_vm3 = vcmp.eq.s32.totalorder %v2054_v8, %v64_v11 }
  0x89   :  { %v1573_v12 = vsel %vm66_vm3, 1.0, %v1943_v4 }
  0x8a   :  { %1689 = vmatmul.mubr.msk.f32.vlgmr.msra.gmra.mrb[0].mxu1 %vm250_vm1, %v1573_v12  ;;  %v1858_v13 = vpack.i.bf16 %v1573_v12, %v1572_v10 }
  0x8b   :  { %1692 = vmatpush3.bf16.msra.mxu1 %v1898_v16  ;;  %1695 = vmatprep.mubr.msk.bf16.mxu1 %vm1947_vm4, %v1943_v4 }
  0x8c   :  { %1859 = vperm.xlu0 %1857, %v1858_v13   ;;  %1847 = vperm.xlu1 %1845, %v1858_v13  }
  0x8d   :  { %1693 = vmatprep.subr.bf16.mxu1 %v1943_v4 }
  0x8f   :  { %1694 = vmatpush3.bf16.msra.mxu1 %v1899_v21 }
  0x90   :  { %1851 = vset.pattern.permute.xlu1 %v1946_v14  ;;  %1884 = vset.pattern.permute.xlu0 %v1942_v1 }
  0x91   :  { %1853 = vperm.xlu1 %1851, %v1858_v13  }
  0x95   :  { %1863 = vset.pattern.permute.xlu1 %v1942_v1 }
  0x96   :  { %1865 = vperm.xlu1 %1863, %v1858_v13  }
  0xe1   :  { %v1703_v47 = vpop.f32.mrb[0].mxu0 }
  0xe2   :  { %v472_v48 = vmul.f32 0.2, %v1703_v47  ;;  %v451_v49 = vpop.f32.mrb[1].mxu0 }
  0xe3   :  { %v1704_v51 = vpop.f32.mrb[2].mxu0 }
  0xe4   :  { %v473_v53 = vmul.f32 0.2, %v1704_v51  ;;  %v454_v54 = vpop.f32.mrb[3].mxu0 }
 0x10b   :  { %v1860_v19 = vpop.permute.xlu0 %1859  ;;  %v1848_v20 = vpop.permute.xlu1 %1847 }
 0x10c   :  { %v1862_v22 = vunpack.i.h.bf16 %v1860_v19  ;;  %v1861_v23 = vunpack.i.l.bf16 %v1860_v19  ;;  %v1850_v24 = vunpack.i.h.bf16 %v1848_v20  ;;  %v1849_v25 = vunpack.i.l.bf16 %v1848_v20 }
 0x10e   :  { %v190_v26 = vmul.f32 %v1850_v24, %v2072_v18  ;;  %v189_v27 = vmul.f32 %v1849_v25, %v2070_v17  ;;  %v210_v28 = vmul.f32 %v1862_v22, %v2072_v18  ;;  %v209_v29 = vmul.f32 %v1861_v23, %v2070_v17 }
 0x110   :  { %v1854_v30 = vpop.permute.xlu1 %1853  ;;  %v1869_v31 = vpack.i.bf16 %v190_v26, %v189_v27  ;;  %v1879_v36 = vpack.i.bf16 %v210_v28, %v209_v29 }
 0x111   :  { %v1856_v32 = vunpack.i.h.bf16 %v1854_v30  ;;  %v1855_v33 = vunpack.i.l.bf16 %v1854_v30 }
 0x112   :  { %1870 = vrot.lane.b32.xlu1 %v1869_v31, %s1948_s6 }
 0x113   :  { %v200_v34 = vmul.f32 %v1856_v32, %v2072_v18  ;;  %v199_v35 = vmul.f32 %v1855_v33, %v2070_v17 }
 0x115   :  { %v1874_v37 = vpack.i.bf16 %v200_v34, %v199_v35  ;;  %v1866_v61 = vpop.permute.xlu1 %1865 }
 0x116   :  { %1880 = vrot.lane.b32.xlu1 %v1879_v36, %s1949_s17  ;;  %v1868_v63 = vunpack.i.h.bf16 %v1866_v61  ;;  %v1867_v0 = vunpack.i.l.bf16 %v1866_v61 }
 0x117   :  { %1875 = vrot.lane.b32.xlu0 %v1874_v37, %s1950_s18 }
 0x118   :  { %v180_v7 = vmul.f32 %v1868_v63, %v2072_v18  ;;  %v179_v9 = vmul.f32 %v1867_v0, %v2070_v17 }
 0x11a   :  { %109 = vperm.xlu1 %1863, %v102_v38  }
 0x11b   :  { %106 = vperm.xlu0 %1884, %v101_v39  }
 0x11e   :  { %112 = vperm.xlu1 %1863, %v103_v40  }
 0x11f   :  { %115 = vperm.xlu0 %1884, %v104_v41  }
 0x122   :  { %76 = vperm.xlu1 %1863, %v71_v43  }
 0x123   :  { %79 = vperm.xlu0 %1884, %v72_v45  }
 0x126   :  { %82 = vperm.xlu1 %1863, %v73_v50   ;;  %v470_v50 = vmul.f32 0.2, %v451_v49 }
 0x127   :  { %85 = vperm.xlu0 %1884, %v74_v52  }
 0x12a   :  { %126 = vperm.xlu1 %1863, %v121_v55  }
 0x12b   :  { %129 = vperm.xlu0 %1884, %v122_v56   ;;  %v471_v56 = vmul.f32 0.2, %v454_v54 }
 0x12e   :  { %132 = vperm.xlu1 %1863, %v123_v57  }
 0x12f   :  { %135 = vperm.xlu0 %1884, %v124_v58  }
 0x15d   :  { %v2139_v59 = vpop.f32.mrb[0].mxu1 }
 0x15e   :  { %v2141_v60 = vpop.f32.mrb[1].mxu1 }
 0x184   :  { %v1871_v62 = vpop.permute.xlu1 %1870 }
 0x185   :  { %v1873_v2 = vunpack.i.h.bf16 %v1871_v62  ;;  %v1872_v3 = vunpack.i.l.bf16 %v1871_v62 }
 0x187   :  { %v237_v13 = vsel %vm235_vm8, %v180_v7, %v1873_v2  ;;  %v236_v14 = vsel %vm235_vm8, %v179_v9, %v1872_v3 }
 0x188   :  { %v1881_v6 = vpop.permute.xlu1 %1880 }
 0x189   :  { %v1876_v10 = vpop.permute.xlu0 %1875  ;;  %v1883_v15 = vunpack.i.h.bf16 %v1881_v6  ;;  %v1882_v16 = vunpack.i.l.bf16 %v1881_v6 }
 0x18a   :  { %v1878_v11 = vunpack.i.h.bf16 %v1876_v10  ;;  %v1877_v12 = vunpack.i.l.bf16 %v1876_v10 }
 0x18c   :  { %v239_v19 = vsel %vm238_vm9, %v236_v14, %v1877_v12  ;;  %v240_v20 = vsel %vm238_vm9, %v237_v13, %v1878_v11  ;;  %v929_v13 = vld [vmem:[%s2407_s15] sm:$0x3] }
 0x18d   :  { %v242_v21 = vsel %vm241_vm10, %v239_v19, %v1882_v16  ;;  %v243_v22 = vsel %vm241_vm10, %v240_v20, %v1883_v15  ;;  %v931_v14 = vsel %vm486_vm6, %v929_v13, 0 }
 0x18e   :  { %v244_v18 = vpack.c.bf16 %v243_v22, %v242_v21 }
 0x190   :  { %1696 = vmatmul.mubr.msk.bf16.vlgmr.msra.gmra.mrb[4].mxu1 %vm346_vm11, %v244_v18 }
 0x199   :  { %v110_v17 = vpop.permute.xlu1 %109 }
 0x19a   :  { %vm118_vm12 = vcmp.eq.s32.totalorder %v2054_v8, %v110_v17  ;;  %v107_v23 = vpop.permute.xlu0 %106 }
 0x19b   :  { %v1579_v24 = vsel %vm118_vm12, 1.0, %v1943_v4  ;;  %vm117_vm13 = vcmp.eq.s32.totalorder %v2054_v8, %v107_v23 }
 0x19c   :  { %v1578_v25 = vsel %vm117_vm13, 1.0, %v1943_v4 }
 0x19d   :  { %v149_v26 = vpack.c.bf16 %v1579_v24, %v1578_v25  ;;  %v113_v27 = vpop.permute.xlu1 %112 }
 0x19e   :  { %vm119_vm14 = vcmp.eq.s32.totalorder %v2054_v8, %v113_v27  ;;  %v116_v28 = vpop.permute.xlu0 %115 }
 0x19f   :  { %v2156_v29 = vsel %vm119_vm14, 1.0, %v1943_v4  ;;  %vm120_vm15 = vcmp.eq.s32.totalorder %v2054_v8, %v116_v28  ;;  %1713 = vmatprep.mubr.msk.bf16.mxu1 %vm238_vm9, %v149_v26  ;;  %vm468_vm14 = vcmp.gt.f32.partialorder %v1703_v47, 0.0 }
 0x1a0   :  { %v2161_v30 = vsel %vm120_vm15, 1.0, %v1943_v4  ;;  %vm466_vm15 = vcmp.gt.f32.partialorder %v451_v49, 0.0  ;;  %v476_v52 = vsel %vm468_vm14, %v1703_v47, %v472_v48 }
 0x1a1   :  { %v150_v31 = vpack.c.bf16 %v2161_v30, %v2156_v29  ;;  %v77_v32 = vpop.permute.xlu1 %76  ;;  %v474_v55 = vsel %vm466_vm15, %v451_v49, %v470_v50  ;;  %v673_v29 = vld [vmem:[%s2403_s11] sm:$0xf] }
 0x1a2   :  { %vm87_vm2 = vcmp.eq.s32.totalorder %v2054_v8, %v77_v32  ;;  %v80_v33 = vpop.permute.xlu0 %79  ;;  %v928_v30 = vld [vmem:[%s2406_s14] sm:$0xf] }
 0x1a3   :  { %v1574_v34 = vsel %vm87_vm2, 1.0, %v1943_v4  ;;  %vm88_vm3 = vcmp.eq.s32.totalorder %v2054_v8, %v80_v33  ;;  %vm469_vm2 = vcmp.gt.f32.partialorder %v1704_v51, 0.0  ;;  %v983_v32 = vsel %vm255_vm0, %v928_v30, 0  ;;  %v672_v33 = vld [vmem:[%s2402_s10] sm:$0xf] }
 0x1a4   :  { %v1575_v35 = vsel %vm88_vm3, 1.0, %v1943_v4  ;;  %vm467_vm3 = vcmp.gt.f32.partialorder %v454_v54, 0.0  ;;  %v477_v57 = vsel %vm469_vm2, %v1704_v51, %v473_v53  ;;  %v739_v51 = vsel %vm255_vm0, %v672_v33, 0 }
 0x1a5   :  { %v99_v36 = vpack.c.bf16 %v1575_v35, %v1574_v34  ;;  %v83_v37 = vpop.permute.xlu1 %82  ;;  %v2199_v58 = vpack.c.bf16 %v477_v57, %v476_v52  ;;  %v475_v61 = vsel %vm467_vm3, %v454_v54, %v471_v56  ;;  %v790_v52 = vld [vmem:[%s2404_s12] sm:$0x3]  ;;  %s1953_s12 = smov [#allocation2]  }
 0x1a6   :  { %vm89_vm7 = vcmp.eq.s32.totalorder %v2054_v8, %v83_v37  ;;  %v86_v38 = vpop.permute.xlu0 %85  ;;  %v2201_v62 = vpack.c.bf16 %v475_v61, %v474_v55  ;;  %v798_v53 = vsel %vm486_vm6, %v790_v52, 0  ;;  %v853_v54 = vld [vmem:[%s2405_s13] sm:$0x3]  ;;  %s1561_s13 = sshll.u32 %s1953_s12, 4  ;;  %s1562_s13 = int_to_ptr.vmem [resolvable:$true] %s1561_s13 }
 0x1a7   :  { %v1576_v39 = vsel %vm89_vm7, 1.0, %v1943_v4  ;;  %vm90_vm10 = vcmp.eq.s32.totalorder %v2054_v8, %v86_v38  ;;  %1707 = vmatprep.mubr.msk.bf16.mxu0 %vm479_vm5, %v99_v36  ;;  %v861_v55 = vsel %vm486_vm6, %v853_v54, 0  ;;  %s1918_s17 = scalar_lea.vmem %s1562_s13, 256  ;;  %p1923_p1 = scmp.lt.s32.totalorder %s1562_s13, %s1562_s13 }
 0x1a8   :  { %v1577_v40 = vsel %vm90_vm10, 1.0, %v1943_v4  ;;  %p1919_p0 = scmp.ne.s32.totalorder %s1562_s13, %s1918_s17  ;;  %p1924_p2 = scmp.lt.s32.totalorder %s1918_s17, %s1918_s17 }
 0x1a9   :  { %v100_v41 = vpack.c.bf16 %v1577_v40, %v1576_v39  ;;  %v2173_v42 = vpop.permute.xlu1 %126 }
 0x1aa   :  { %vm137_vm12 = vcmp.eq.s32.totalorder %v2054_v8, %v2173_v42  ;;  %v2177_v43 = vpop.permute.xlu0 %129  ;;  %p1925_p3 = por %p1924_p2, %p1923_p1 }
 0x1ab   :  { %v2183_v44 = vsel %vm137_vm12, 1.0, %v1943_v4  ;;  %vm138_vm13 = vcmp.eq.s32.totalorder %v2054_v8, %v2177_v43  ;;  %1708 = vmatmul.mubr.msk.bf16.vlgmr.msra.gmra.mrb[4].mxu0 %vm479_vm5, %v100_v41 }
 0x1ac   :  { %v2191_v45 = vsel %vm138_vm13, 1.0, %v1943_v4  ;;  %p1926_p4 = pnand %p1925_p3, %p1919_p0 }
 0x1ad   :  { %v2195_v46 = vpack.c.bf16 %v2191_v45, %v2183_v44  ;;  %v2203_v63 = vpop.permute.xlu1 %132 }
 0x1ae   :  { %v2205_v0 = vpop.permute.xlu0 %135  ;;  %vm139_vm5 = vcmp.eq.s32.totalorder %v2054_v8, %v2203_v63 }
 0x1af   :  { %1719 = vmatprep.mubr.msk.bf16.mxu0 %vm238_vm9, %v2195_v46  ;;  %vm140_vm7 = vcmp.eq.s32.totalorder %v2054_v8, %v2205_v0  ;;  %v2217_v12 = vsel %vm139_vm5, 1.0, %v1943_v4 }
 0x263   :  { %v384_v2 = vpop.f32.mrb[4].mxu1 }
 0x264   :  { %v385_v3 = vadd.f32 %v384_v2, %v2141_v60  ;;  %v1697_v6 = vpop.f32.mrb[5].mxu1  ;;  %v2223_v60 = vsel %vm140_vm7, 1.0, %v1943_v4 }
 0x265   :  { %v387_v7 = vpop.f32.mrb[6].mxu1 }
 0x266   :  { %v388_v9 = vadd.f32 %v2139_v59, %v387_v7  ;;  %v1698_v10 = vpop.f32.mrb[7].mxu1  ;;  %v2230_v59 = vpack.c.bf16 %v2223_v60, %v2217_v12 }
 0x268   :  { %v557_v11 = vpack.c.bf16 %v388_v9, %v385_v3 }
 0x26a   :  { %1711 = vmatprep.subr.bf16.mxu1 %v557_v11  ;;  %1717 = vmatprep.subr.bf16.mxu0 %v557_v11 }
 0x26b   :  { %1712 = vmatpush3.bf16.msra.mxu1 %v557_v11  ;;  %1718 = vmatpush3.bf16.msra.mxu0 %v557_v11 }
 0x26c   :  { %1829 = vmatprep.subr.msk.bf16.mxu0 %vm486_vm6, %v929_v13  ;;  %1825 = vmatprep.subr.msk.bf16.mxu1 %vm255_vm0, %v673_v29 }
 0x26e   :  { %1714 = vmatmul.mubr.msk.bf16.vlgmr.msra.gmra.mrb[8].mxu1 %vm238_vm9, %v150_v31  ;;  %1720 = vmatmul.mubr.msk.bf16.vlgmr.msra.gmra.mrb[8].mxu0 %vm238_vm9, %v2230_v59  ;;  %v681_v31 = vsel %vm255_vm0, %v673_v29, 0 }
 0x26f   :  { %1748 = vmatpush3.bf16.msra.mxu0 %v931_v14  ;;  %1749 = vmatprep.mubr.msk.bf16.mxu0 %vm250_vm1, %v2201_v62 }
 0x270   :  { %1830 = vmatprep.subr.msk.bf16.mxu0 %vm255_vm0, %v928_v30  ;;  %1724 = vmatpush3.bf16.msra.mxu1 %v681_v31 }
 0x271   :  { %1826 = vmatprep.subr.msk.bf16.mxu1 %vm255_vm0, %v672_v33 }
 0x276   :  { %1750 = vmatmul.mubr.msk.bf16.vlgmr.msra.gmra.mrb[12].mxu0 %vm250_vm1, %v2199_v58 }
 0x277   :  { %1754 = vmatpush3.bf16.msra.mxu0 %v983_v32 }
 0x27e   :  { %v1709_v15 = vpop.f32.mrb[4].mxu0 }
 0x27f   :  { %v547_v16 = vmul.f32 0.2, %v1709_v15  ;;  %v526_v19 = vpop.f32.mrb[5].mxu0  ;;  %vm543_vm10 = vcmp.gt.f32.partialorder %v1709_v15, 0.0 }
 0x280   :  { %v545_v20 = vmul.f32 0.2, %v526_v19  ;;  %v1710_v21 = vpop.f32.mrb[6].mxu0  ;;  %vm541_vm14 = vcmp.gt.f32.partialorder %v526_v19, 0.0 }
 0x281   :  { %vm544_vm15 = vcmp.gt.f32.partialorder %v1710_v21, 0.0  ;;  %v548_v22 = vmul.f32 0.2, %v1710_v21  ;;  %v529_v18 = vpop.f32.mrb[7].mxu0  ;;  %v551_v23 = vsel %vm543_vm10, %v1709_v15, %v547_v16 }
 0x282   :  { %vm542_vm2 = vcmp.gt.f32.partialorder %v529_v18, 0.0  ;;  %v546_v17 = vmul.f32 0.2, %v529_v18  ;;  %v549_v25 = vsel %vm541_vm14, %v526_v19, %v545_v20  ;;  %v1952_v19 = vmov -1e+30  }
 0x283   :  { %v552_v24 = vsel %vm544_vm15, %v1710_v21, %v548_v22  ;;  %v163_v20 = vsel %vm139_vm5, 0.0, %v1952_v19  ;;  %v164_v22 = vsel %vm140_vm7, 0.0, %v1952_v19 }
 0x284   :  { %v556_v26 = vpack.c.bf16 %v552_v24, %v551_v23  ;;  %v550_v27 = vsel %vm542_vm2, %v529_v18, %v546_v17 }
 0x285   :  { %v555_v28 = vpack.c.bf16 %v550_v27, %v549_v25  ;;  %v162_v27 = vsel %vm138_vm13, 0.0, %v1952_v19 }
 0x341   :  { %v1715_v34 = vpop.f32.mrb[8].mxu1  ;;  %v1721_v35 = vpop.f32.mrb[8].mxu0 }
 0x342   :  { %v598_v36 = vpop.f32.mrb[9].mxu1  ;;  %v653_v37 = vpop.f32.mrb[9].mxu0 }
 0x343   :  { %v1716_v38 = vpop.f32.mrb[10].mxu1  ;;  %v1722_v39 = vpop.f32.mrb[10].mxu0 }
 0x344   :  { %v669_v40 = vpack.c.bf16 %v1716_v38, %v1715_v34  ;;  %v671_v41 = vpack.c.bf16 %v1722_v39, %v1721_v35  ;;  %v601_v47 = vpop.f32.mrb[11].mxu1  ;;  %v656_v48 = vpop.f32.mrb[11].mxu0 }
 0x345   :  { %v668_v49 = vpack.c.bf16 %v601_v47, %v598_v36  ;;  %v670_v50 = vpack.c.bf16 %v656_v48, %v653_v37 }
 0x347   :  { %1725 = vmatprep.mubr.msk.bf16.mxu1 %vm235_vm8, %v668_v49  ;;  %1755 = vmatprep.mubr.msk.bf16.mxu0 %vm235_vm8, %v668_v49 }
 0x348   :  { %1726 = vmatmul.mubr.msk.bf16.vlgmr.msra.gmra.mrb[12].mxu1 %vm235_vm8, %v669_v40  ;;  %1756 = vmatmul.mubr.msk.bf16.vlgmr.msra.gmra.mrb[12].mxu0 %vm235_vm8, %v669_v40 }
 0x349   :  { %1731 = vmatprep.mubr.msk.bf16.mxu1 %vm235_vm8, %v670_v50  ;;  %1761 = vmatprep.mubr.msk.f32.mxu0 %vm238_vm9, %v2183_v44 }
 0x34a   :  { %1730 = vmatpush3.bf16.msra.mxu1 %v739_v51 }
 0x34b   :  { %1827 = vmatprep.subr.msk.bf16.mxu1 %vm486_vm6, %v790_v52 }
 0x354   :  { %1732 = vmatmul.mubr.msk.bf16.vlgmr.msra.gmra.mrb[12].mxu1 %vm235_vm8, %v671_v41 }
 0x355   :  { %1737 = vmatprep.mubr.msk.bf16.mxu1 %vm250_vm1, %v555_v28  ;;  %1736 = vmatpush3.bf16.msra.mxu1 %v798_v53 }
 0x356   :  { %1828 = vmatprep.subr.msk.bf16.mxu1 %vm486_vm6, %v853_v54 }
 0x360   :  { %1738 = vmatmul.mubr.msk.bf16.vlgmr.msra.gmra.mrb[12].mxu1 %vm250_vm1, %v556_v26 }
 0x361   :  { %1743 = vmatprep.mubr.msk.bf16.mxu1 %vm250_vm1, %v2201_v62  ;;  %1742 = vmatpush3.bf16.msra.mxu1 %v861_v55 }
 0x36c   :  { %1744 = vmatmul.mubr.msk.bf16.vlgmr.msra.gmra.mrb[12].mxu1 %vm250_vm1, %v2199_v58 }
 0x36d   :  { %1782 = vmatprep.mubr.msk.f32.mxu1 %vm238_vm9, %v2183_v44 }
 0x41b   :  { %v2285_v56 = vpop.f32.mrb[12].mxu0 }
 0x41c   :  { %v2287_v57 = vpop.f32.mrb[13].mxu0 }
 0x41d   :  { %v2289_v61 = vpop.f32.mrb[14].mxu0 }
 0x41e   :  { %v2291_v2 = vpop.f32.mrb[15].mxu0 }
 0x43f   :  { %v1745_v3 = vpop.f32.mrb[12].mxu1 }
 0x440   :  { %vm918_vm0 = vcmp.gt.f32.partialorder %v1745_v3, 0.0  ;;  %v922_v6 = vmul.f32 0.2, %v1745_v3  ;;  %v897_v7 = vpop.f32.mrb[13].mxu1 }
 0x441   :  { %v1746_v62 = vpop.f32.mrb[14].mxu1  ;;  %v920_v9 = vmul.f32 0.2, %v897_v7  ;;  %vm916_vm1 = vcmp.gt.f32.partialorder %v897_v7, 0.0 }
 0x442   :  { %vm919_vm6 = vcmp.gt.f32.partialorder %v1746_v62, 0.0  ;;  %v923_v10 = vmul.f32 0.2, %v1746_v62  ;;  %v900_v58 = vpop.f32.mrb[15].mxu1  ;;  %v2293_v11 = vsel %vm918_vm0, %v1745_v3, %v922_v6 }
 0x443   :  { %1046 = vperm.xlu1 %1863, %v2293_v11   ;;  %v921_v13 = vmul.f32 0.2, %v900_v58  ;;  %vm917_vm3 = vcmp.gt.f32.partialorder %v900_v58, 0.0  ;;  %v2299_v15 = vsel %vm916_vm1, %v897_v7, %v920_v9 }
 0x444   :  { %v2296_v14 = vsel %vm919_vm6, %v1746_v62, %v923_v10 }
 0x445   :  { %1051 = vperm.xlu0 %1884, %v2296_v14   ;;  %v2302_v16 = vsel %vm917_vm3, %v900_v58, %v921_v13 }
 0x447   :  { %1036 = vperm.xlu1 %1863, %v2299_v15  }
 0x449   :  { %1041 = vperm.xlu0 %1884, %v2302_v16  }
 0x44b   :  { %1885 = vset.pattern.permute.xlu1 %v1944_v5 }
 0x44c   :  { %1072 = vperm.xlu1 %1885, %v2299_v15  }
 0x44d   :  { %1886 = vset.pattern.permute.xlu0 %v1944_v5 }
 0x44e   :  { %1076 = vperm.xlu0 %1886, %v2302_v16  }
 0x450   :  { %1080 = vperm.xlu1 %1885, %v2293_v11  }
 0x454   :  { %1084 = vperm.xlu1 %1885, %v2296_v14  }
 0x46c   :  { %1218 = vxpose.xlu0.b32.start [1/4] (short) (narrow) %v2183_v44, 16  ;;  %v161_v44 = vsel %vm137_vm12, 0.0, %v1952_v19  ;;  %vm1104_vm12 = vcmask 1040384  }
 0x470   :  { %1219 = vxpose.xlu0.b32.cont [2/4] (short) (narrow) %v2191_v45, 16 }
 0x474   :  { %1220 = vxpose.xlu0.b32.cont [3/4] (short) (narrow) %v2217_v12, 16 }
 0x478   :  { %1221 = vxpose.xlu0.b32.end [4/4] (short) (narrow) %v2223_v60, 16 }
 0x4c2   :  { %v1047_v5 = vpop.permute.xlu1 %1046 }
 0x4c3   :  { %v1056_v21 = vadd.f32 %v1047_v5, %v163_v20 }
 0x4c4   :  { %v1052_v18 = vpop.permute.xlu0 %1051 }
 0x4c5   :  { %v1057_v17 = vadd.f32 %v1052_v18, %v164_v22  ;;  %v1060_v24 = vsel %vm238_vm9, %v1056_v21, -inf }
 0x4c6   :  { %v1037_v23 = vpop.permute.xlu1 %1036 }
 0x4c7   :  { %v1061_v25 = vsel %vm238_vm9, %v1057_v17, -inf  ;;  %v1054_v26 = vadd.f32 %v1037_v23, %v161_v44 }
 0x4c8   :  { %v1063_v63 = vmax.f32 %v1060_v24, %v1061_v25  ;;  %v1042_v28 = vpop.permute.xlu0 %1041 }
 0x4c9   :  { %v1055_v0 = vadd.f32 %v1042_v28, %v162_v27  ;;  %v1058_v29 = vsel %vm238_vm9, %v1054_v26, -inf }
 0x4cb   :  { %v1059_v30 = vsel %vm238_vm9, %v1055_v0, -inf  ;;  %v1073_v31 = vpop.permute.xlu1 %1072 }
 0x4cc   :  { %v1062_v42 = vmax.f32 %v1058_v29, %v1059_v30  ;;  %v1087_v32 = vadd.f32 %v1073_v31, %v161_v44 }
 0x4cd   :  { %v1077_v33 = vpop.permute.xlu0 %1076 }
 0x4ce   :  { %v1064_v34 = vmax.f32 %v1062_v42, %v1063_v63  ;;  %v1088_v35 = vadd.f32 %v1077_v33, %v162_v27  ;;  %v1091_v37 = vsel %vm238_vm9, %v1087_v32, -inf }
 0x4cf   :  { %v1081_v36 = vpop.permute.xlu1 %1080 }
 0x4d0   :  { %v1092_v38 = vsel %vm238_vm9, %v1088_v35, -inf  ;;  %v1065_v39 = vrot.slane %v1064_v34, 4  ;;  %v1089_v43 = vadd.f32 %v1081_v36, %v163_v20 }
 0x4d1   :  { %v1095_v8 = vmax.f32 %v1091_v37, %v1092_v38 }
 0x4d2   :  { %v1066_v47 = vmax.f32 %v1064_v34, %v1065_v39  ;;  %v1093_v48 = vsel %vm238_vm9, %v1089_v43, -inf }
 0x4d3   :  { %v1085_v40 = vpop.permute.xlu1 %1084 }
 0x4d4   :  { %v1090_v41 = vadd.f32 %v1085_v40, %v164_v22  ;;  %v1067_v51 = vrot.slane %v1066_v47, 2 }
 0x4d6   :  { %v1094_v49 = vsel %vm238_vm9, %v1090_v41, -inf  ;;  %v1068_v54 = vmax.f32 %v1066_v47, %v1067_v51 }
 0x4d7   :  { %v1096_v50 = vmax.f32 %v1093_v48, %v1094_v49 }
 0x4d8   :  { %v1069_v7 = vrot.slane %v1068_v54, 1 }
 0x4d9   :  { %v1097_v52 = vmax.f32 %v1095_v8, %v1096_v50 }
 0x4da   :  { %v1070_v9 = vmax.f32 %v1068_v54, %v1069_v7 }
 0x4db   :  { %v1098_v53 = vrot.slane %v1097_v52, 4 }
 0x4dd   :  { %v1099_v55 = vmax.f32 %v1097_v52, %v1098_v53 }
 0x4df   :  { %v1100_v3 = vrot.slane %v1099_v55, 2 }
 0x4e1   :  { %v1101_v6 = vmax.f32 %v1099_v55, %v1100_v3 }
 0x4e3   :  { %v1102_v62 = vrot.slane %v1101_v6, 1 }
 0x4e5   :  { %v1103_v10 = vmax.f32 %v1101_v6, %v1102_v62 }
 0x4e7   :  { %v1105_v58 = vsel %vm1104_vm12, %v1070_v9, %v1103_v10 }
 0x4e8   :  { %1759 = vmatprep.subr.msk.mxu0 %vm238_vm9, %v1105_v58 }
 0x4e9   :  { %1760 = vmatpush3.xpose.msk.msra.mxu0 %vm238_vm9, %v1105_v58 }
 0x4ec   :  { %1762 = vmatmul.mubr.msk.f32.vlgmr.msra.gmra.mrb[16].mxu0 %vm238_vm9, %v2191_v45  ;;  %v1234_v13 = vpop.trf.xlu0 }
 0x4ed   :  { %1764 = vmatprep.mubr.msk.f32.mxu0 %vm238_vm9, %v2217_v12 }
 0x4f0   :  { %1765 = vmatmul.mubr.msk.f32.gmra.mrb[18].mxu0 %vm238_vm9, %v2223_v60  ;;  %v1235_v29 = vpop.trf.xlu0 }
 0x4f1   :  { %1775 = vmatprep.mubr.msk.f32.mxu0 %vm346_vm11, %v1234_v13 }
 0x5bf   :  { %v1763_v19 = vpop.f32.mrb[16].mxu0 }
 0x5c0   :  { %v1207_v20 = vsub.f32 %v2302_v16, %v1763_v19  ;;  %v1187_v5 = vpop.f32.mrb[17].mxu0 }
 0x5c1   :  { %v1206_v21 = vsub.f32 %v2299_v15, %v1187_v5 }
 0x5c2   :  { %v1212_v22 = vmul.f32 1.442695, %v1207_v20 }
 0x5c3   :  { %v1210_v18 = vmul.f32 1.442695, %v1206_v21  ;;  %v1766_v17 = vpop.f32.mrb[18].mxu0 }
 0x5c4   :  { %1902 = vpow2.f32 %v1212_v22  ;;  %v1209_v44 = vsub.f32 %v2296_v14, %v1766_v17  ;;  %v1197_v23 = vpop.f32.mrb[19].mxu0 }
 0x5c5   :  { %1904 = vpow2.f32 %v1210_v18  ;;  %v1208_v24 = vsub.f32 %v2293_v11, %v1197_v23 }
 0x5c6   :  { %v1216_v25 = vmul.f32 1.442695, %v1209_v44 }
 0x5c7   :  { %v1214_v26 = vmul.f32 1.442695, %v1208_v24 }
 0x5c8   :  { %1906 = vpow2.f32 %v1216_v25 }
 0x5c9   :  { %1908 = vpow2.f32 %v1214_v26 }
 0x5ce   :  { %v1903_v63 = vpop.eup %1902 }
 0x5cf   :  { %v1905_v27 = vpop.eup %1904 }
 0x5d0   :  { %v1796_v16 = vpack.c.bf16 %v1903_v63, %v1905_v27 }
 0x5d2   :  { %v1907_v28 = vpop.eup %1906  ;;  %1797 = vmatprep.subr.bf16.mxu0 %v1796_v16 }
 0x5d3   :  { %v1909_v15 = vpop.eup %1908  ;;  %1799 = vmatpush3.bf16.msra.mxu0 %v1796_v16 }
 0x5d4   :  { %v1800_v0 = vpack.c.bf16 %v1907_v28, %v1909_v15 }
 0x5d6   :  { %1801 = vmatprep.subr.bf16.mxu0 %v1800_v0 }
 0x5d7   :  { %1803 = vmatpush3.bf16.msra.mxu0 %v1800_v0 }
 0x5d8   :  { %1788 = vmatprep.subr.bf16.mxu0 %v1943_v4 }
 0x5da   :  { %1776 = vmatmul.mubr.msk.f32.vlgmr.msra.gmra.mrb[20].mxu0 %vm346_vm11, %v1235_v29 }
 0x5db   :  { %1792 = vmatprep.mubr.msk.bf16.mxu0 %vm1947_vm4, %v1943_v4 }
 0x6ad   :  { %v1777_v11 = vpop.f32.mrb[20].mxu0 }
 0x6ae   :  { %v1322_v14 = vpop.f32.mrb[21].mxu0 }
 0x6af   :  { %v1804_v30 = vpack.c.bf16 %v1777_v11, %v1322_v14 }
 0x6b1   :  { %1805 = vmatprep.subr.bf16.mxu1 %v1804_v30 }
 0x6b2   :  { %1807 = vmatpush3.bf16.msra.mxu1 %v1804_v30 }
 0x6b5   :  { %1783 = vmatmul.mubr.msk.f32.vlgmr.msra.gmra.mrb[2].mxu1 %vm238_vm9, %v2191_v45 }
 0x6b6   :  { %1785 = vmatprep.mubr.msk.f32.mxu1 %vm238_vm9, %v2217_v12 }
 0x6b9   :  { %1786 = vmatmul.mubr.msk.f32.gmra.mrb[16].mxu1 %vm238_vm9, %v2223_v60 }
 0x788   :  { %v1784_v31 = vpop.f32.mrb[2].mxu1 }
 0x789   :  { %v1403_v42 = vadd.f32 1e-16, %v1784_v31  ;;  %v1397_v32 = vpop.f32.mrb[3].mxu1 }
 0x78a   :  { %v1398_v33 = vadd.f32 1e-16, %v1397_v32 }
 0x78b   :  { %1910 = vrcp.f32 %v1403_v42 }
 0x78c   :  { %v1787_v34 = vpop.f32.mrb[16].mxu1  ;;  %1912 = vrcp.f32 %v1398_v33 }
 0x78d   :  { %v1407_v35 = vpop.f32.mrb[17].mxu1  ;;  %v1413_v37 = vadd.f32 1e-16, %v1787_v34 }
 0x78e   :  { %v1408_v36 = vadd.f32 1e-16, %v1407_v35 }
 0x790   :  { %1914 = vrcp.f32 %v1408_v36 }
 0x791   :  { %1916 = vrcp.f32 %v1413_v37 }
 0x795   :  { %v1911_v38 = vpop.eup %1910 }
 0x796   :  { %v1419_v45 = vmul.f32 %v1911_v38, %v1903_v63  ;;  %v1913_v39 = vpop.eup %1912 }
 0x797   :  { %v1417_v12 = vmul.f32 %v1913_v39, %v1905_v27 }
 0x798   :  { %1453 = vperm.xlu1 %1885, %v1419_v45  }
 0x79a   :  { %v1915_v8 = vpop.eup %1914 }
 0x79b   :  { %v1421_v60 = vmul.f32 %v1915_v8, %v1909_v15  ;;  %v1917_v43 = vpop.eup %1916 }
 0x79c   :  { %1449 = vperm.xlu1 %1885, %v1417_v12   ;;  %v1423_v40 = vmul.f32 %v1917_v43, %v1907_v28 }
 0x7a0   :  { %1457 = vperm.xlu1 %1885, %v1421_v60  }
 0x7a4   :  { %1461 = vperm.xlu1 %1885, %v1423_v40  }
 0x7a8   :  { %1887 = vset.pattern.permute.xlu1 %v1942_v1 }
 0x7a9   :  { %1426 = vperm.xlu1 %1887, %v1417_v12  }
 0x7ad   :  { %1431 = vperm.xlu1 %1887, %v1419_v45  }
 0x7b1   :  { %1441 = vperm.xlu1 %1887, %v1423_v40  }
 0x7b5   :  { %1436 = vperm.xlu1 %1887, %v1421_v60  }
 0x817   :  { %v1454_v41 = vpop.permute.xlu1 %1453 }
 0x818   :  { %v1465_v48 = vmul.f32 %v1454_v41, %v2291_v2 }
 0x81b   :  { %v1450_v47 = vpop.permute.xlu1 %1449 }
 0x81c   :  { %v1464_v49 = vmul.f32 %v1450_v47, %v2287_v57 }
 0x81e   :  { %v1888_v50 = vpack.i.bf16 %v1465_v48, %v1464_v49 }
 0x81f   :  { %v1458_v51 = vpop.permute.xlu1 %1457 }
 0x820   :  { %1889 = vrot.lane.b32.xlu1 %v1888_v50, %s1948_s6  ;;  %v1466_v53 = vmul.f32 %v2285_v56, %v1458_v51 }
 0x823   :  { %v1462_v52 = vpop.permute.xlu1 %1461 }
 0x824   :  { %v1467_v54 = vmul.f32 %v2289_v61, %v1462_v52 }
 0x826   :  { %v1893_v1 = vpack.i.bf16 %v1467_v54, %v1466_v53 }
 0x828   :  { %1894 = vrot.lane.b32.xlu1 %v1893_v1, %s1948_s6  ;;  %v1427_v55 = vpop.permute.xlu1 %1426 }
 0x829   :  { %v1444_v9 = vmul.f32 %v1427_v55, %v2287_v57 }
 0x82c   :  { %v1432_v3 = vpop.permute.xlu1 %1431 }
 0x82d   :  { %v1445_v10 = vmul.f32 %v1432_v3, %v2291_v2 }
 0x830   :  { %v1442_v6 = vpop.permute.xlu1 %1441 }
 0x834   :  { %v1437_v7 = vpop.permute.xlu1 %1436 }
 0x835   :  { %v1446_v21 = vmul.f32 %v2285_v56, %v1437_v7 }
 0x84b   :  { %1490 = vxpose.xlu1.c.b16.start [1/2] (short) (narrow) %v2195_v46, 16 }
 0x84f   :  { %1491 = vxpose.xlu1.c.b16.end [2/2] (short) (narrow) %v2230_v59, 16  ;;  %v1447_v59 = vmul.f32 %v2289_v61, %v1442_v6 }
 0x892   :  { %v1890_v62 = vpop.permute.xlu1 %1889 }
 0x893   :  { %v1892_v58 = vunpack.i.h.bf16 %v1890_v62  ;;  %v1891_v13 = vunpack.i.l.bf16 %v1890_v62 }
 0x895   :  { %v1485_v19 = vsel %vm235_vm8, %v1445_v10, %v1892_v58  ;;  %v1484_v20 = vsel %vm235_vm8, %v1444_v9, %v1891_v13 }
 0x896   :  { %v1488_v5 = vpack.c.bf16 %v1485_v19, %v1484_v20 }
 0x898   :  { %1789 = vmatpush3.bf16.msra.mxu0 %v1488_v5 }
 0x899   :  { %1790 = vmatprep.subr.bf16.mxu0 %v1943_v4 }
 0x89a   :  { %v1895_v46 = vpop.permute.xlu1 %1894 }
 0x89b   :  { %v1897_v22 = vunpack.i.h.bf16 %v1895_v46  ;;  %v1896_v18 = vunpack.i.l.bf16 %v1895_v46 }
 0x89d   :  { %v1487_v57 = vsel %vm235_vm8, %v1447_v59, %v1897_v22  ;;  %v1486_v2 = vsel %vm235_vm8, %v1446_v21, %v1896_v18 }
 0x89e   :  { %v1489_v17 = vpack.c.bf16 %v1487_v57, %v1486_v2 }
 0x8a0   :  { %1791 = vmatpush3.bf16.msra.mxu0 %v1489_v17 }
 0x8b1   :  { %v1498_v44 = vpop.trf.xlu1 }
 0x8b2   :  { %1793 = vmatmul.mubr.msk.bf16.vlgmr.msra.gmra.mrb[24].mxu0 %vm346_vm11, %v1498_v44 }
 0x985   :  { %v1543_v23 = vpop.f32.mrb[24].mxu0 }
 0x986   :  { %v1550_v24 = vmax.f32 %v1543_v23, 0.0  ;;  %v1794_v25 = vpop.f32.mrb[25].mxu0 }
 0x987   :  { %v1546_v4 = vpop.f32.mrb[26].mxu0 }
 0x988   :  { %v1552_v61 = vsel %vm238_vm9, %v1550_v24, 0.0  ;;  %v1551_v56 = vmax.f32 %v1546_v4, 0.0  ;;  %v1795_v26 = vpop.f32.mrb[27].mxu0 }
 0x989   :  { %1554 = vst [vmem:[#allocation2] sm:$0xff] %v1552_v61 }
 0x98a   :  { %v1553_v63 = vsel %vm238_vm9, %v1551_v56, 0.0 }
 0x98b   :  { %1555 = vst [vmem:[#allocation2 + $0x8] sm:$0xff] %v1553_v63 }
 0x98c   :  { %1929 = shalt.err (!%p1926_p4)
}
 0x98d   :  { %s1930_s20 = scalar_lea.hbm %s2408_s16, 256 }
 0x98e   :  { %p1931_p5 = scmp.ne.s32.totalorder %s2408_s16, %s1930_s20  ;;  %p1934_p6 = scmp.lt.u32.totalorder %s1930_s20, %s2408_s16 }
 0x990   :  { %p1936_p7 = pnand %p1934_p6, %p1931_p5 }
 0x992   :  { %1939 = shalt.err (!%p1936_p7)
}
 0x993   :  { %s1954_s24 = smov 128  }
 0x994   :  { %1567 = dma.vmem_to_hbm [thread:$0]  %s1562_s13, 256, %s2408_s16, [#allocation3], %s1954_s24, %s1954_s24, %s1948_s6  }
 0x995   :  { %1940 = dma.done.wait [#allocation3], 256  }
 0x996   :  { %1941 = vsyncadd [#allocation3], 4294967040 }
 0x997   :  { %1571 = vsyncpa [#allocation3], 1 }

</bundles_post_ra>
